<compile_context>
chip_gen: v7x
topology: tpu7x:2x2x1
jax: 0.10.0
libtpu: 0.0.40
codegen_flags: <defaults>
</compile_context>

<pallas_src>
import functools
import math

import jax
import jax.numpy as jnp
from jax.experimental import pallas as pl
from jax.experimental.pallas import tpu as pltpu


def _mlp_kernel(fold, feat, embed_dim,
                x_ref, w1_ref, b1_ref, w2_ref, b2_ref, w3_ref, b3_ref, o_ref):
    """x_ref: (tm_f, fold*feat). Weights/biases are full, grid-invariant blocks.

    Each of the `fold` streams is one of `fold` consecutive original rows; compute is
    exactly the unfolded MLP (no zero-padded weights), only the final store is folded
    so the output block is lane-dense (last dim % 128 == 0).
    """
    w1 = w1_ref[...]
    b1 = b1_ref[...]
    w2 = w2_ref[...]
    b2 = b2_ref[...]
    w3 = w3_ref[...]
    b3 = b3_ref[...]

    outs = []
    for j in range(fold):  # static, fully unrolled (fold <= 8)
        xj = x_ref[:, j * feat:(j + 1) * feat].astype(jnp.float32)
        # Layer 1 on the MXU (K=2 is lane-sparse but the MXU slot is far from binding).
        h = jnp.dot(xj, w1, preferred_element_type=jnp.float32) + b1
        h = jnp.maximum(h, 0.0)
        h = jnp.dot(h, w2, preferred_element_type=jnp.float32) + b2
        h = jnp.maximum(h, 0.0)
        outs.append(jnp.dot(h, w3, preferred_element_type=jnp.float32) + b3)

    # Lane-concat (XLU relayout, otherwise-idle unit) -> lane-dense store + full-line DMA.
    o = outs[0] if fold == 1 else jnp.concatenate(outs, axis=-1)
    # TODO(synk): store bf16 here (and accept bf16 downstream) to halve HBM writeback;
    # kept at the input dtype to match the torch module's float32 semantics.
    o_ref[...] = o.astype(o_ref.dtype)


def _round_up(a, b):
    return (a + b - 1) // b * b


@functools.partial(jax.jit, static_argnames=("tm",))
def depth_aware_layer(x, params, tm=8192):
    """x: [..., 2]. params: w1 (2,64), b1 (1,64), w2 (64,128), b2 (1,128),
    w3 (128,E), b3 (1,E). Returns [..., E]."""
    w1, b1 = params["w1"], params["b1"]
    w2, b2 = params["w2"], params["b2"]
    w3, b3 = params["w3"], params["b3"]
    embed_dim = w3.shape[1]
    feat = x.shape[-1]

    lead_shape = x.shape[:-1]
    n = math.prod(lead_shape) if lead_shape else 1

    # Fold factor so the output block is lane-dense (last dim % 128 == 0). embed_dim=32 ->
    # fold=4: four consecutive rows map to one 128-wide output row. Compute is NOT folded.
    fold = 1 if embed_dim % 128 == 0 else 128 // math.gcd(embed_dim, 128)
    if fold > 8:      # awkward embed_dim: fall back to a narrow (masked) output store.
        fold = 1

    x2d = x.reshape(n, feat)
    # Pad rows so n_f = n_pad/fold is a multiple of 8 (sublane granularity); pads <= fold*8-1
    # rows. The ragged last grid block (if any) is masked by Pallas.
    n_pad = _round_up(max(n, 1), fold * 8)
    if n_pad != n:
        x2d = jnp.pad(x2d, ((0, n_pad - n), (0, 0)))
    n_f = n_pad // fold

    # Contiguous reshape (pure relayout): fold consecutive rows into one wide input row.
    xf = x2d.reshape(n_f, fold * feat)

    # Row tile in folded rows. Big tile amortizes per-step overhead; in/out double buffers
    # + weights + intermediates stay ~<16 MiB at tm_f=2048, safe on v7x's 64 MiB VMEM.
    tm_f = max(8, (tm // fold) // 8 * 8)
    tm_f = min(tm_f, n_f)
    grid = (pl.cdiv(n_f, tm_f),)

    flops = 2 * n_pad * (feat * 64 + 64 * 128 + 128 * embed_dim)
    bytes_accessed = 4 * (n_pad * (feat + embed_dim)
                          + w1.size + b1.size + w2.size + b2.size + w3.size + b3.size)

    full = lambda i: (0, 0)  # grid-invariant weights/biases -> DMA'd once by the pipeline
    kernel = functools.partial(_mlp_kernel, fold, feat, embed_dim)

    out_f = pl.pallas_call(
        kernel,
        out_shape=jax.ShapeDtypeStruct((n_f, fold * embed_dim), x.dtype),
        grid_spec=pltpu.PrefetchScalarGridSpec(
            num_scalar_prefetch=0,
            grid=grid,
            in_specs=[
                pl.BlockSpec((tm_f, fold * feat), lambda i: (i, 0)),   # x tile
                pl.BlockSpec(w1.shape, full),
                pl.BlockSpec(b1.shape, full),
                pl.BlockSpec(w2.shape, full),
                pl.BlockSpec(b2.shape, full),
                pl.BlockSpec(w3.shape, full),
                pl.BlockSpec(b3.shape, full),
            ],
            out_specs=pl.BlockSpec((tm_f, fold * embed_dim), lambda i: (i, 0)),
        ),
        compiler_params=pltpu.CompilerParams(
            # Row axis fully parallel -> shards across the 2 TensorCores on v7x.
            dimension_semantics=("parallel",),
            # Explicit so the tile is valid on v5e/v6e scoped defaults and under v7x's 64 MiB.
            vmem_limit_bytes=48 * 1024 * 1024,
        ),
        cost_estimate=pl.CostEstimate(
            flops=flops, transcendentals=0, bytes_accessed=bytes_accessed),
    )(xf, w1, b1, w2, b2, w3, b3)

    out = out_f.reshape(n_pad, embed_dim)   # contiguous reshape back, zero-copy relayout
    if n_pad != n:
        out = out[:n]
    return out.reshape(*lead_shape, embed_dim)


def init_params(key, embed_dim):
    """Deterministic synthetic init matching nn.Linear(2,64), (64,128), (128,embed_dim)."""
    k1, k2, k3, k4, k5, k6 = jax.random.split(key, 6)
    # weights stored as [in, out] (transpose of torch's [out, in]); biases as [1, out]
    w1 = jax.random.normal(k1, (2, 64), jnp.float32) * (1.0 / jnp.sqrt(2.0))
    b1 = jax.random.normal(k2, (1, 64), jnp.float32) * 0.01
    w2 = jax.random.normal(k3, (64, 128), jnp.float32) * (1.0 / jnp.sqrt(64.0))
    b2 = jax.random.normal(k4, (1, 128), jnp.float32) * 0.01
    w3 = jax.random.normal(k5, (128, embed_dim), jnp.float32) * (1.0 / jnp.sqrt(128.0))
    b3 = jax.random.normal(k6, (1, embed_dim), jnp.float32) * 0.01
    return {"w1": w1, "b1": b1, "w2": w2, "b2": b2, "w3": w3, "b3": b3}


def reference(x, params):
    """Pure-JAX reference for validation (high-precision matmuls)."""
    hp = jax.lax.Precision.HIGHEST
    h = jnp.maximum(jnp.dot(x, params["w1"], precision=hp) + params["b1"][0], 0.0)
    h = jnp.maximum(jnp.dot(h, params["w2"], precision=hp) + params["b2"][0], 0.0)
    return jnp.dot(h, params["w3"], precision=hp) + params["b3"][0]


if __name__ == "__main__":
    key = jax.random.PRNGKey(0)
    embed_dim = 32
    batch, seq = 2, 8  # x: [batch, seq, 2] -> out: [batch, seq, embed_dim]

    kp, kx = jax.random.split(key)
    params = init_params(kp, embed_dim)
    x = jax.random.normal(kx, (batch, seq, 2), jnp.float32)

    out = depth_aware_layer(x, params)
    out = jax.block_until_ready(out)

    ref = reference(x.reshape(-1, 2), params).reshape(batch, seq, embed_dim)
    assert out.shape == (batch, seq, embed_dim), out.shape
    err = float(jnp.max(jnp.abs(out - ref)))
    # Tolerance covers MXU f32 matmul decomposition differences vs the XLA reference.
    assert err < 1e-2, f"mismatch vs reference, max abs err = {err}"

    print("KERNEL_OK")
</pallas_src>

<mosaic_0001>
module attributes {stable_mosaic.version = 11 : i64} {
  func.func @_mlp_kernel(%arg0: i32, %arg1: memref<8x8xf32, #tpu.memory_space<vmem>>, %arg2: memref<2x64xf32, #tpu.memory_space<vmem>>, %arg3: memref<1x64xf32, #tpu.memory_space<vmem>>, %arg4: memref<64x128xf32, #tpu.memory_space<vmem>>, %arg5: memref<1x128xf32, #tpu.memory_space<vmem>>, %arg6: memref<128x32xf32, #tpu.memory_space<vmem>>, %arg7: memref<1x32xf32, #tpu.memory_space<vmem>>, %arg8: memref<8x128xf32, #tpu.memory_space<vmem>>) attributes {dimension_semantics = [#tpu.dimension_semantics<parallel>], iteration_bounds = array<i64: 1>, scalar_prefetch = 0 : i64, scratch_operands = 0 : i64, tpu.core_type = #tpu.core_type<tc>, window_params = [{transform_indices = @transform_0, window_bounds = array<i64: 8, 8>}, {pipeline_mode = #tpu.pipeline_mode<synchronous>, transform_indices = @transform_1, window_bounds = array<i64: 2, 64>}, {pipeline_mode = #tpu.pipeline_mode<synchronous>, transform_indices = @transform_2, window_bounds = array<i64: 1, 64>}, {pipeline_mode = #tpu.pipeline_mode<synchronous>, transform_indices = @transform_3, window_bounds = array<i64: 64, 128>}, {pipeline_mode = #tpu.pipeline_mode<synchronous>, transform_indices = @transform_4, window_bounds = array<i64: 1, 128>}, {pipeline_mode = #tpu.pipeline_mode<synchronous>, transform_indices = @transform_5, window_bounds = array<i64: 128, 32>}, {pipeline_mode = #tpu.pipeline_mode<synchronous>, transform_indices = @transform_6, window_bounds = array<i64: 1, 32>}, {transform_indices = @transform_7, window_bounds = array<i64: 8, 128>}]} {
    %c0 = arith.constant 0 : index
    %c0_0 = arith.constant 0 : index
    %0 = vector.load %arg2[%c0, %c0_0] : memref<2x64xf32, #tpu.memory_space<vmem>>, vector<2x64xf32>
    %c0_1 = arith.constant 0 : index
    %c0_2 = arith.constant 0 : index
    %1 = vector.load %arg3[%c0_1, %c0_2] : memref<1x64xf32, #tpu.memory_space<vmem>>, vector<1x64xf32>
    %c0_3 = arith.constant 0 : index
    %c0_4 = arith.constant 0 : index
    %2 = vector.load %arg4[%c0_3, %c0_4] : memref<64x128xf32, #tpu.memory_space<vmem>>, vector<64x128xf32>
    %c0_5 = arith.constant 0 : index
    %c0_6 = arith.constant 0 : index
    %3 = vector.load %arg5[%c0_5, %c0_6] : memref<1x128xf32, #tpu.memory_space<vmem>>, vector<1x128xf32>
    %c0_7 = arith.constant 0 : index
    %c0_8 = arith.constant 0 : index
    %4 = vector.load %arg6[%c0_7, %c0_8] : memref<128x32xf32, #tpu.memory_space<vmem>>, vector<128x32xf32>
    %c0_9 = arith.constant 0 : index
    %c0_10 = arith.constant 0 : index
    %5 = vector.load %arg7[%c0_9, %c0_10] : memref<1x32xf32, #tpu.memory_space<vmem>>, vector<1x32xf32>
    %c0_11 = arith.constant 0 : index
    %c0_12 = arith.constant 0 : index
    %6 = vector.load %arg1[%c0_11, %c0_12] : memref<8x8xf32, #tpu.memory_space<vmem>>, vector<8x2xf32>
    %cst = arith.constant dense<0.000000e+00> : vector<8x64xf32>
    %7 = tpu.matmul %6, %0, %cst {dimension_numbers = #tpu.dot_dimension_numbers<[1], [0], [0], [1], [0, 0, 1, 1], [], []>} : vector<8x2xf32>, vector<2x64xf32>, vector<8x64xf32> -> vector<8x64xf32>
    %8 = vector.broadcast %1 : vector<1x64xf32> to vector<8x64xf32>
    %9 = arith.addf %7, %8 : vector<8x64xf32>
    %cst_13 = arith.constant 0.000000e+00 : f32
    %10 = vector.broadcast %cst_13 : f32 to vector<8x64xf32>
    %11 = arith.maximumf %9, %10 : vector<8x64xf32>
    %cst_14 = arith.constant dense<0.000000e+00> : vector<8x128xf32>
    %12 = tpu.matmul %11, %2, %cst_14 {dimension_numbers = #tpu.dot_dimension_numbers<[1], [0], [0], [1], [0, 0, 1, 1], [], []>} : vector<8x64xf32>, vector<64x128xf32>, vector<8x128xf32> -> vector<8x128xf32>
    %13 = vector.broadcast %3 : vector<1x128xf32> to vector<8x128xf32>
    %14 = arith.addf %12, %13 : vector<8x128xf32>
    %cst_15 = arith.constant 0.000000e+00 : f32
    %15 = vector.broadcast %cst_15 : f32 to vector<8x128xf32>
    %16 = arith.maximumf %14, %15 : vector<8x128xf32>
    %cst_16 = arith.constant dense<0.000000e+00> : vector<8x32xf32>
    %17 = tpu.matmul %16, %4, %cst_16 {dimension_numbers = #tpu.dot_dimension_numbers<[1], [0], [0], [1], [0, 0, 1, 1], [], []>} : vector<8x128xf32>, vector<128x32xf32>, vector<8x32xf32> -> vector<8x32xf32>
    %18 = vector.broadcast %5 : vector<1x32xf32> to vector<8x32xf32>
    %19 = arith.addf %17, %18 : vector<8x32xf32>
    %c0_17 = arith.constant 0 : index
    %c2 = arith.constant 2 : index
    %20 = vector.load %arg1[%c0_17, %c2] : memref<8x8xf32, #tpu.memory_space<vmem>>, vector<8x2xf32>
    %cst_18 = arith.constant dense<0.000000e+00> : vector<8x64xf32>
    %21 = tpu.matmul %20, %0, %cst_18 {dimension_numbers = #tpu.dot_dimension_numbers<[1], [0], [0], [1], [0, 0, 1, 1], [], []>} : vector<8x2xf32>, vector<2x64xf32>, vector<8x64xf32> -> vector<8x64xf32>
    %22 = vector.broadcast %1 : vector<1x64xf32> to vector<8x64xf32>
    %23 = arith.addf %21, %22 : vector<8x64xf32>
    %cst_19 = arith.constant 0.000000e+00 : f32
    %24 = vector.broadcast %cst_19 : f32 to vector<8x64xf32>
    %25 = arith.maximumf %23, %24 : vector<8x64xf32>
    %cst_20 = arith.constant dense<0.000000e+00> : vector<8x128xf32>
    %26 = tpu.matmul %25, %2, %cst_20 {dimension_numbers = #tpu.dot_dimension_numbers<[1], [0], [0], [1], [0, 0, 1, 1], [], []>} : vector<8x64xf32>, vector<64x128xf32>, vector<8x128xf32> -> vector<8x128xf32>
    %27 = vector.broadcast %3 : vector<1x128xf32> to vector<8x128xf32>
    %28 = arith.addf %26, %27 : vector<8x128xf32>
    %cst_21 = arith.constant 0.000000e+00 : f32
    %29 = vector.broadcast %cst_21 : f32 to vector<8x128xf32>
    %30 = arith.maximumf %28, %29 : vector<8x128xf32>
    %cst_22 = arith.constant dense<0.000000e+00> : vector<8x32xf32>
    %31 = tpu.matmul %30, %4, %cst_22 {dimension_numbers = #tpu.dot_dimension_numbers<[1], [0], [0], [1], [0, 0, 1, 1], [], []>} : vector<8x128xf32>, vector<128x32xf32>, vector<8x32xf32> -> vector<8x32xf32>
    %32 = vector.broadcast %5 : vector<1x32xf32> to vector<8x32xf32>
    %33 = arith.addf %31, %32 : vector<8x32xf32>
    %c0_23 = arith.constant 0 : index
    %c4 = arith.constant 4 : index
    %34 = vector.load %arg1[%c0_23, %c4] : memref<8x8xf32, #tpu.memory_space<vmem>>, vector<8x2xf32>
    %cst_24 = arith.constant dense<0.000000e+00> : vector<8x64xf32>
    %35 = tpu.matmul %34, %0, %cst_24 {dimension_numbers = #tpu.dot_dimension_numbers<[1], [0], [0], [1], [0, 0, 1, 1], [], []>} : vector<8x2xf32>, vector<2x64xf32>, vector<8x64xf32> -> vector<8x64xf32>
    %36 = vector.broadcast %1 : vector<1x64xf32> to vector<8x64xf32>
    %37 = arith.addf %35, %36 : vector<8x64xf32>
    %cst_25 = arith.constant 0.000000e+00 : f32
    %38 = vector.broadcast %cst_25 : f32 to vector<8x64xf32>
    %39 = arith.maximumf %37, %38 : vector<8x64xf32>
    %cst_26 = arith.constant dense<0.000000e+00> : vector<8x128xf32>
    %40 = tpu.matmul %39, %2, %cst_26 {dimension_numbers = #tpu.dot_dimension_numbers<[1], [0], [0], [1], [0, 0, 1, 1], [], []>} : vector<8x64xf32>, vector<64x128xf32>, vector<8x128xf32> -> vector<8x128xf32>
    %41 = vector.broadcast %3 : vector<1x128xf32> to vector<8x128xf32>
    %42 = arith.addf %40, %41 : vector<8x128xf32>
    %cst_27 = arith.constant 0.000000e+00 : f32
    %43 = vector.broadcast %cst_27 : f32 to vector<8x128xf32>
    %44 = arith.maximumf %42, %43 : vector<8x128xf32>
    %cst_28 = arith.constant dense<0.000000e+00> : vector<8x32xf32>
    %45 = tpu.matmul %44, %4, %cst_28 {dimension_numbers = #tpu.dot_dimension_numbers<[1], [0], [0], [1], [0, 0, 1, 1], [], []>} : vector<8x128xf32>, vector<128x32xf32>, vector<8x32xf32> -> vector<8x32xf32>
    %46 = vector.broadcast %5 : vector<1x32xf32> to vector<8x32xf32>
    %47 = arith.addf %45, %46 : vector<8x32xf32>
    %c0_29 = arith.constant 0 : index
    %c6 = arith.constant 6 : index
    %48 = vector.load %arg1[%c0_29, %c6] : memref<8x8xf32, #tpu.memory_space<vmem>>, vector<8x2xf32>
    %cst_30 = arith.constant dense<0.000000e+00> : vector<8x64xf32>
    %49 = tpu.matmul %48, %0, %cst_30 {dimension_numbers = #tpu.dot_dimension_numbers<[1], [0], [0], [1], [0, 0, 1, 1], [], []>} : vector<8x2xf32>, vector<2x64xf32>, vector<8x64xf32> -> vector<8x64xf32>
    %50 = vector.broadcast %1 : vector<1x64xf32> to vector<8x64xf32>
    %51 = arith.addf %49, %50 : vector<8x64xf32>
    %cst_31 = arith.constant 0.000000e+00 : f32
    %52 = vector.broadcast %cst_31 : f32 to vector<8x64xf32>
    %53 = arith.maximumf %51, %52 : vector<8x64xf32>
    %cst_32 = arith.constant dense<0.000000e+00> : vector<8x128xf32>
    %54 = tpu.matmul %53, %2, %cst_32 {dimension_numbers = #tpu.dot_dimension_numbers<[1], [0], [0], [1], [0, 0, 1, 1], [], []>} : vector<8x64xf32>, vector<64x128xf32>, vector<8x128xf32> -> vector<8x128xf32>
    %55 = vector.broadcast %3 : vector<1x128xf32> to vector<8x128xf32>
    %56 = arith.addf %54, %55 : vector<8x128xf32>
    %cst_33 = arith.constant 0.000000e+00 : f32
    %57 = vector.broadcast %cst_33 : f32 to vector<8x128xf32>
    %58 = arith.maximumf %56, %57 : vector<8x128xf32>
    %cst_34 = arith.constant dense<0.000000e+00> : vector<8x32xf32>
    %59 = tpu.matmul %58, %4, %cst_34 {dimension_numbers = #tpu.dot_dimension_numbers<[1], [0], [0], [1], [0, 0, 1, 1], [], []>} : vector<8x128xf32>, vector<128x32xf32>, vector<8x32xf32> -> vector<8x32xf32>
    %60 = vector.broadcast %5 : vector<1x32xf32> to vector<8x32xf32>
    %61 = arith.addf %59, %60 : vector<8x32xf32>
    %62 = tpu.concatenate %19, %33, %47, %61 in 1 : vector<8x32xf32>, vector<8x32xf32>, vector<8x32xf32>, vector<8x32xf32> -> vector<8x128xf32>
    %c0_35 = arith.constant 0 : index
    %c0_36 = arith.constant 0 : index
    %63 = vector.load %arg8[%c0_35, %c0_36] : memref<8x128xf32, #tpu.memory_space<vmem>>, vector<8x128xf32>
    tpu.vector_store %arg8[%c0_35, %c0_36], %62 {strides = array<i32>} : memref<8x128xf32, #tpu.memory_space<vmem>>, vector<8x128xf32>,
    return
  }
  func.func @transform_0(%arg0: i32) -> (i32, i32) {
    %c0_i32 = arith.constant 0 : i32
    %c0_i32_0 = arith.constant 0 : i32
    return %arg0, %c0_i32 : i32, i32
  }
  func.func @transform_1(%arg0: i32) -> (i32, i32) {
    %c0_i32 = arith.constant 0 : i32
    %c0_i32_0 = arith.constant 0 : i32
    %c0_i32_1 = arith.constant 0 : i32
    return %c0_i32, %c0_i32_0 : i32, i32
  }
  func.func @transform_2(%arg0: i32) -> (i32, i32) {
    %c0_i32 = arith.constant 0 : i32
    %c0_i32_0 = arith.constant 0 : i32
    %c0_i32_1 = arith.constant 0 : i32
    return %c0_i32, %c0_i32_0 : i32, i32
  }
  func.func @transform_3(%arg0: i32) -> (i32, i32) {
    %c0_i32 = arith.constant 0 : i32
    %c0_i32_0 = arith.constant 0 : i32
    %c0_i32_1 = arith.constant 0 : i32
    return %c0_i32, %c0_i32_0 : i32, i32
  }
  func.func @transform_4(%arg0: i32) -> (i32, i32) {
    %c0_i32 = arith.constant 0 : i32
    %c0_i32_0 = arith.constant 0 : i32
    %c0_i32_1 = arith.constant 0 : i32
    return %c0_i32, %c0_i32_0 : i32, i32
  }
  func.func @transform_5(%arg0: i32) -> (i32, i32) {
    %c0_i32 = arith.constant 0 : i32
    %c0_i32_0 = arith.constant 0 : i32
    %c0_i32_1 = arith.constant 0 : i32
    return %c0_i32, %c0_i32_0 : i32, i32
  }
  func.func @transform_6(%arg0: i32) -> (i32, i32) {
    %c0_i32 = arith.constant 0 : i32
    %c0_i32_0 = arith.constant 0 : i32
    %c0_i32_1 = arith.constant 0 : i32
    return %c0_i32, %c0_i32_0 : i32, i32
  }
  func.func @transform_7(%arg0: i32) -> (i32, i32) {
    %c0_i32 = arith.constant 0 : i32
    %c0_i32_0 = arith.constant 0 : i32
    return %arg0, %c0_i32 : i32, i32
  }
}

</mosaic_0001>

<bundles_post_ra>
// kernel: depth_aware_layer.1
= control target key start
LH: loop header
LB: loop body
LE: loop exit
PB: predicated region body
PF: predicated region fallthrough
CT: control target
= control target key end

     0   :  { %vm65_vm0 = vcmask 1041408   ;;  %vm61_vm1 = vcmask 15360   ;;  %v1492_v0 = vmov 0.0   ;;  %vm1493_vm2 = vmmov 0   ;;  %s1494_s30 = smov 126   ;;  %s1496_s20 = smov 124   ;;  %s1819_s1 = inlined_call_operand.vmem [shape: f32[2,64], index: 1, kind: input, shape index: {}]   ;;  %s1820_s0 = inlined_call_operand.vmem [shape: f32[8,8], index: 0, kind: input, shape index: {}]   ;;  %s1821_s3 = inlined_call_operand.vmem [shape: f32[64,128], index: 3, kind: input, shape index: {}]   ;;  %s1822_s5 = inlined_call_operand.vmem [shape: f32[128,32], index: 5, kind: input, shape index: {}]   ;;  %s1823_s2 = inlined_call_operand.vmem [shape: f32[1,64], index: 2, kind: input, shape index: {}]   ;;  %s1824_s4 = inlined_call_operand.vmem [shape: f32[1,128], index: 4, kind: input, shape index: {}]   ;;  %s1825_s6 = inlined_call_operand.vmem [shape: f32[1,32], index: 6, kind: input, shape index: {}]   ;;  %s1826_s7 = inlined_call_operand.vmem [shape: f32[8,128], index: 7, kind: output, shape index: {}]  }
   0x1   :  { %1103 = vmatprep.subr.mxu0 %v1492_v0  ;;  %v1545_v1 = vld [vmem:[%s1819_s1] sm:$0x3]  ;;  %1105 = vmatprep.mubr.msk.f32.mxu0 %vm1493_vm2, %v1492_v0  ;;  %v29_v4 = vld [vmem:[%s1821_s3 + $0x8] sm:$0xff]  ;;  %v30_v5 = vld [vmem:[%s1821_s3 + $0x10] sm:$0xff]  ;;  %v1495_v7 = vmov 0.0|0.0   ;;  %vm146_vm3 = vcmask 523264  }
   0x2   :  { %v1552_v2 = vld [vmem:[%s1820_s0] sm:$0xff]  ;;  %1104 = vmatpush3.msk.msra.mxu0 %vm65_vm0, %v1545_v1  ;;  %v31_v6 = vld [vmem:[%s1821_s3 + $0x18] sm:$0xff]  ;;  %1339 = vmatprep.subr.bf16.mxu1 %v1495_v7  ;;  %v33_v11 = vld [vmem:[%s1821_s3 + $0x28] sm:$0xff]  ;;  %s1497_s27 = smov 122   ;;  %s1500_s1 = smov 96   ;;  %vm966_vm4 = vcmask 261120  }
   0x3   :  { %v28_v3 = vld [vmem:[%s1821_s3] sm:$0xff]  ;;  %297 = vrot.lane.b32.xlu0 %v1552_v2, %s1494_s30  ;;  %1106 = vmatmul.mubr.msk.f32.vlgmr.msra.gmra.mrb[0].mxu0 %vm61_vm1, %v1552_v2  ;;  %v1578_v9 = vpack.c.bf16 %v31_v6, %v30_v5  ;;  %v34_v13 = vld [vmem:[%s1821_s3 + $0x30] sm:$0xff]  ;;  %v35_v14 = vld [vmem:[%s1821_s3 + $0x38] sm:$0xff]  ;;  %s1498_s30 = smov 32   ;;  %vm969_vm5 = vcmask 785408  }
   0x4   :  { %v1572_v8 = vpack.c.bf16 %v29_v4, %v28_v3  ;;  %1124 = vmatprep.mubr.msk.f32.mxu1 %vm1493_vm2, %v1492_v0  ;;  %1351 = vmatprep.subr.bf16.mxu0 %v1495_v7  ;;  %v32_v10 = vld [vmem:[%s1821_s3 + $0x20] sm:$0xff]  ;;  %v1601_v15 = vpack.c.bf16 %v35_v14, %v34_v13  ;;  %v38_v17 = vld [vmem:[%s1822_s5 + $0x8] sm:$0xff]  ;;  %v39_v18 = vld [vmem:[%s1822_s5 + $0x10] sm:$0xff] }
   0x5   :  { %1159 = vmatprep.mubr.msk.f32.mxu0 %vm1493_vm2, %v1492_v0  ;;  %v1590_v12 = vpack.c.bf16 %v33_v11, %v32_v10  ;;  %v37_v16 = vld [vmem:[%s1822_s5] sm:$0xff]  ;;  %v40_v20 = vld [vmem:[%s1822_s5 + $0x18] sm:$0xff]  ;;  %v42_v23 = vld [vmem:[%s1822_s5 + $0x28] sm:$0xff]  ;;  %735 = vrot.lane.b32.xlu1 %v1552_v2, %s1497_s27 }
   0x6   :  { %1341 = vmatpush3.bf16.msra.mxu1 %v1572_v8  ;;  %v1615_v19 = vpack.c.bf16 %v38_v17, %v37_v16  ;;  %v1621_v21 = vpack.c.bf16 %v40_v20, %v39_v18  ;;  %v41_v22 = vld [vmem:[%s1822_s5 + $0x20] sm:$0xff]  ;;  %v43_v25 = vld [vmem:[%s1822_s5 + $0x30] sm:$0xff]  ;;  %v44_v26 = vld [vmem:[%s1822_s5 + $0x38] sm:$0xff] }
   0x7   :  { %1342 = vmatprep.subr.bf16.mxu1 %v1495_v7  ;;  %516 = vrot.lane.b32.xlu0 %v1552_v2, %s1496_s20  ;;  %v1631_v24 = vpack.c.bf16 %v42_v23, %v41_v22  ;;  %v1641_v27 = vpack.c.bf16 %v44_v26, %v43_v25  ;;  %v45_v28 = vld [vmem:[%s1822_s5 + $0x40] sm:$0xff]  ;;  %v46_v29 = vld [vmem:[%s1822_s5 + $0x48] sm:$0xff]  ;;  %v47_v31 = vld [vmem:[%s1822_s5 + $0x50] sm:$0xff] }
   0x8   :  { %1353 = vmatpush3.bf16.msra.mxu0 %v1615_v19  ;;  %v1651_v30 = vpack.c.bf16 %v46_v29, %v45_v28  ;;  %v48_v32 = vld [vmem:[%s1822_s5 + $0x58] sm:$0xff]  ;;  %v49_v34 = vld [vmem:[%s1822_s5 + $0x60] sm:$0xff]  ;;  %v50_v35 = vld [vmem:[%s1822_s5 + $0x68] sm:$0xff] }
   0x9   :  { %1354 = vmatprep.subr.bf16.mxu0 %v1495_v7  ;;  %v1661_v33 = vpack.c.bf16 %v48_v32, %v47_v31  ;;  %v1671_v36 = vpack.c.bf16 %v50_v35, %v49_v34  ;;  %v1679_v37 = vld [vmem:[%s1823_s2] ss:$0 sm:$0xff]  ;;  %v51_v43 = vld [vmem:[%s1822_s5 + $0x70] sm:$0xff]  ;;  %v52_v44 = vld [vmem:[%s1822_s5 + $0x78] sm:$0xff] }
   0xa   :  { %1344 = vmatpush3.bf16.msra.mxu1 %v1578_v9  ;;  %v1705_v45 = vpack.c.bf16 %v52_v44, %v51_v43  ;;  %v1713_v46 = vld [vmem:[%s1824_s4] ss:$0 sm:$0xff] }
   0xb   :  { %1345 = vmatprep.subr.bf16.mxu1 %v1495_v7 }
   0xc   :  { %1356 = vmatpush3.bf16.msra.mxu0 %v1621_v21 }
   0xd   :  { %1357 = vmatprep.subr.bf16.mxu0 %v1495_v7 }
   0xe   :  { %1347 = vmatpush3.bf16.msra.mxu1 %v1590_v12 }
   0xf   :  { %1348 = vmatprep.subr.bf16.mxu1 %v1495_v7 }
  0x10   :  { %1359 = vmatpush3.bf16.msra.mxu0 %v1631_v24 }
  0x11   :  { %1360 = vmatprep.subr.bf16.mxu0 %v1495_v7 }
  0x12   :  { %1350 = vmatpush3.bf16.msra.mxu1 %v1601_v15 }
  0x13   :  { %1162 = vmatprep.subr.mxu1 %v1492_v0 }
  0x14   :  { %1362 = vmatpush3.bf16.msra.mxu0 %v1641_v27 }
  0x15   :  { %1363 = vmatprep.subr.bf16.mxu0 %v1495_v7 }
  0x18   :  { %1365 = vmatpush3.bf16.msra.mxu0 %v1651_v30 }
  0x19   :  { %1366 = vmatprep.subr.bf16.mxu0 %v1495_v7 }
  0x1c   :  { %1368 = vmatpush3.bf16.msra.mxu0 %v1661_v33 }
  0x1d   :  { %1369 = vmatprep.subr.bf16.mxu0 %v1495_v7 }
  0x20   :  { %1371 = vmatpush3.bf16.msra.mxu0 %v1671_v36 }
  0x21   :  { %1372 = vmatprep.subr.bf16.mxu0 %v1495_v7 }
  0x24   :  { %1374 = vmatpush3.bf16.msra.mxu0 %v1705_v45 }
  0x25   :  { %1387 = vmatprep.subr.bf16.mxu0 %v1495_v7 }
  0x75   :  { %v298_v42 = vpop.permute.xlu0 %297 }
  0x77   :  { %v736_v3 = vpop.permute.xlu1 %735 }
  0x79   :  { %v517_v55 = vpop.permute.xlu0 %516 }
  0xd6   :  { %v135_v38 = vpop.f32.mrb[0].mxu0 }
  0xd7   :  { %v136_v39 = vadd.f32 %v1679_v37, %v135_v38  ;;  %v1107_v40 = vpop.f32.mrb[1].mxu0 }
  0xd9   :  { %v139_v41 = vmax.f32 %v136_v39, 0.0 }
  0xdb   :  { %1125 = vmatmul.mubr.msk.f32.vlgmr.msra.gmra.mrb[0].mxu1 %vm146_vm3, %v139_v41 }
  0xdc   :  { %1163 = vmatpush3.msk.msra.mxu1 %vm65_vm0, %v1545_v1  ;;  %1164 = vmatprep.mubr.msk.f32.mxu1 %vm1493_vm2, %v1492_v0 }
  0xdd   :  { %1375 = vmatprep.subr.bf16.mxu1 %v1495_v7 }
  0xdf   :  { %1165 = vmatmul.mubr.msk.f32.vlgmr.msra.gmra.mrb[2].mxu1 %vm61_vm1, %v298_v42 }
  0xe0   :  { %1377 = vmatpush3.bf16.msra.mxu1 %v1572_v8  ;;  %1183 = vmatprep.mubr.msk.f32.mxu1 %vm1493_vm2, %v1492_v0 }
  0xe1   :  { %1378 = vmatprep.subr.bf16.mxu1 %v1495_v7 }
  0xe4   :  { %1380 = vmatpush3.bf16.msra.mxu1 %v1578_v9 }
  0xe5   :  { %1381 = vmatprep.subr.bf16.mxu1 %v1495_v7 }
  0xe8   :  { %1383 = vmatpush3.bf16.msra.mxu1 %v1590_v12 }
  0xe9   :  { %1384 = vmatprep.subr.bf16.mxu1 %v1495_v7 }
  0xec   :  { %1386 = vmatpush3.bf16.msra.mxu1 %v1601_v15 }
  0xed   :  { %1221 = vmatprep.subr.mxu1 %v1492_v0 }
 0x1ae   :  { %v216_v47 = vpop.f32.mrb[0].mxu1 }
 0x1af   :  { %v217_v48 = vadd.f32 %v1713_v46, %v216_v47  ;;  %v1126_v49 = vpop.f32.mrb[1].mxu1 }
 0x1b1   :  { %v220_v50 = vmax.f32 %v217_v48, 0.0 }
 0x1b2   :  { %v367_v51 = vpop.f32.mrb[2].mxu1 }
 0x1b3   :  { %v368_v52 = vadd.f32 %v1679_v37, %v367_v51  ;;  %1160 = vmatmul.mubr.f32.vlgmr.msra.gmra.mrb[2].mxu0 %v220_v50  ;;  %v1166_v53 = vpop.f32.mrb[3].mxu1 }
 0x1b4   :  { %1389 = vmatpush3.bf16.msra.mxu0 %v1615_v19  ;;  %1218 = vmatprep.mubr.msk.f32.mxu0 %vm1493_vm2, %v1492_v0 }
 0x1b5   :  { %v371_v54 = vmax.f32 %v368_v52, 0.0  ;;  %1390 = vmatprep.subr.bf16.mxu0 %v1495_v7 }
 0x1b7   :  { %1184 = vmatmul.mubr.msk.f32.vlgmr.msra.gmra.mrb[4].mxu1 %vm146_vm3, %v371_v54 }
 0x1b8   :  { %1222 = vmatpush3.msk.msra.mxu1 %vm65_vm0, %v1545_v1  ;;  %1223 = vmatprep.mubr.msk.f32.mxu1 %vm1493_vm2, %v1492_v0 }
 0x1b9   :  { %1392 = vmatpush3.bf16.msra.mxu0 %v1621_v21  ;;  %1411 = vmatprep.subr.bf16.mxu1 %v1495_v7 }
 0x1ba   :  { %1393 = vmatprep.subr.bf16.mxu0 %v1495_v7 }
 0x1bb   :  { %1224 = vmatmul.mubr.msk.f32.vlgmr.msra.gmra.mrb[6].mxu1 %vm61_vm1, %v517_v55 }
 0x1bc   :  { %1413 = vmatpush3.bf16.msra.mxu1 %v1572_v8  ;;  %1242 = vmatprep.mubr.msk.f32.mxu1 %vm1493_vm2, %v1492_v0 }
 0x1bd   :  { %1395 = vmatpush3.bf16.msra.mxu0 %v1631_v24  ;;  %1414 = vmatprep.subr.bf16.mxu1 %v1495_v7 }
 0x1be   :  { %1396 = vmatprep.subr.bf16.mxu0 %v1495_v7 }
 0x1c0   :  { %1416 = vmatpush3.bf16.msra.mxu1 %v1578_v9 }
 0x1c1   :  { %1398 = vmatpush3.bf16.msra.mxu0 %v1641_v27  ;;  %1417 = vmatprep.subr.bf16.mxu1 %v1495_v7 }
 0x1c2   :  { %1399 = vmatprep.subr.bf16.mxu0 %v1495_v7 }
 0x1c4   :  { %1419 = vmatpush3.bf16.msra.mxu1 %v1590_v12 }
 0x1c5   :  { %1401 = vmatpush3.bf16.msra.mxu0 %v1651_v30  ;;  %1420 = vmatprep.subr.bf16.mxu1 %v1495_v7 }
 0x1c6   :  { %1402 = vmatprep.subr.bf16.mxu0 %v1495_v7 }
 0x1c8   :  { %1422 = vmatpush3.bf16.msra.mxu1 %v1601_v15 }
 0x1c9   :  { %1404 = vmatpush3.bf16.msra.mxu0 %v1661_v33  ;;  %1423 = vmatprep.subr.bf16.mxu1 %v1495_v7 }
 0x1ca   :  { %1405 = vmatprep.subr.bf16.mxu0 %v1495_v7 }
 0x1cd   :  { %1407 = vmatpush3.bf16.msra.mxu0 %v1671_v36 }
 0x1ce   :  { %1408 = vmatprep.subr.bf16.mxu0 %v1495_v7 }
 0x1d1   :  { %1410 = vmatpush3.bf16.msra.mxu0 %v1705_v45 }
 0x1d2   :  { %1280 = vmatprep.subr.mxu0 %v1492_v0 }
 0x286   :  { %v1752_v56 = vpop.f32.mrb[2].mxu0 }
 0x287   :  { %v1161_v57 = vpop.f32.mrb[3].mxu0 }
 0x28a   :  { %v441_v58 = vpop.f32.mrb[4].mxu1 }
 0x28b   :  { %v442_v59 = vadd.f32 %v1713_v46, %v441_v58  ;;  %v1185_v60 = vpop.f32.mrb[5].mxu1 }
 0x28d   :  { %v445_v61 = vmax.f32 %v442_v59, 0.0 }
 0x28e   :  { %v586_v62 = vpop.f32.mrb[6].mxu1 }
 0x28f   :  { %v587_v63 = vadd.f32 %v1679_v37, %v586_v62  ;;  %1219 = vmatmul.mubr.f32.vlgmr.msra.gmra.mrb[4].mxu0 %v445_v61  ;;  %v1225_v2 = vpop.f32.mrb[7].mxu1 }
 0x290   :  { %1281 = vmatpush3.msk.msra.mxu0 %vm65_vm0, %v1545_v1  ;;  %1282 = vmatprep.mubr.msk.f32.mxu0 %vm1493_vm2, %v1492_v0  ;;  %v981_v1 = vld [vmem:[%s1825_s6] ss:$0 sm:$0xff]  ;;  %s1499_s6 = smov 64  }
 0x291   :  { %v590_v4 = vmax.f32 %v587_v63, 0.0  ;;  %1459 = vmatprep.subr.bf16.mxu0 %v1495_v7 }
 0x293   :  { %1243 = vmatmul.mubr.msk.f32.vlgmr.msra.gmra.mrb[8].mxu1 %vm146_vm3, %v590_v4  ;;  %1283 = vmatmul.mubr.msk.f32.vlgmr.msra.gmra.mrb[6].mxu0 %vm61_vm1, %v736_v3 }
 0x294   :  { %1425 = vmatpush3.bf16.msra.mxu1 %v1615_v19  ;;  %1277 = vmatprep.mubr.msk.f32.mxu1 %vm1493_vm2, %v1492_v0 }
 0x295   :  { %1426 = vmatprep.subr.bf16.mxu1 %v1495_v7  ;;  %1461 = vmatpush3.bf16.msra.mxu0 %v1615_v19 }
 0x296   :  { %1462 = vmatprep.subr.bf16.mxu0 %v1495_v7  ;;  %1336 = vmatprep.mubr.msk.f32.mxu0 %vm1493_vm2, %v1492_v0 }
 0x298   :  { %1428 = vmatpush3.bf16.msra.mxu1 %v1621_v21 }
 0x299   :  { %1429 = vmatprep.subr.bf16.mxu1 %v1495_v7  ;;  %1464 = vmatpush3.bf16.msra.mxu0 %v1621_v21 }
 0x29a   :  { %1465 = vmatprep.subr.bf16.mxu0 %v1495_v7 }
 0x29c   :  { %1431 = vmatpush3.bf16.msra.mxu1 %v1631_v24 }
 0x29d   :  { %1432 = vmatprep.subr.bf16.mxu1 %v1495_v7  ;;  %1467 = vmatpush3.bf16.msra.mxu0 %v1631_v24 }
 0x29e   :  { %1468 = vmatprep.subr.bf16.mxu0 %v1495_v7 }
 0x2a0   :  { %1434 = vmatpush3.bf16.msra.mxu1 %v1641_v27 }
 0x2a1   :  { %1435 = vmatprep.subr.bf16.mxu1 %v1495_v7  ;;  %1470 = vmatpush3.bf16.msra.mxu0 %v1641_v27 }
 0x2a2   :  { %1471 = vmatprep.subr.bf16.mxu0 %v1495_v7 }
 0x2a4   :  { %1437 = vmatpush3.bf16.msra.mxu1 %v1651_v30 }
 0x2a5   :  { %1438 = vmatprep.subr.bf16.mxu1 %v1495_v7  ;;  %1473 = vmatpush3.bf16.msra.mxu0 %v1651_v30 }
 0x2a6   :  { %1474 = vmatprep.subr.bf16.mxu0 %v1495_v7 }
 0x2a8   :  { %1440 = vmatpush3.bf16.msra.mxu1 %v1661_v33 }
 0x2a9   :  { %1441 = vmatprep.subr.bf16.mxu1 %v1495_v7  ;;  %1476 = vmatpush3.bf16.msra.mxu0 %v1661_v33 }
 0x2aa   :  { %1477 = vmatprep.subr.bf16.mxu0 %v1495_v7 }
 0x2ac   :  { %1443 = vmatpush3.bf16.msra.mxu1 %v1671_v36 }
 0x2ad   :  { %1444 = vmatprep.subr.bf16.mxu1 %v1495_v7  ;;  %1479 = vmatpush3.bf16.msra.mxu0 %v1671_v36 }
 0x2ae   :  { %1480 = vmatprep.subr.bf16.mxu0 %v1495_v7 }
 0x2b0   :  { %1446 = vmatpush3.bf16.msra.mxu1 %v1705_v45 }
 0x2b1   :  { %1447 = vmatprep.subr.bf16.mxu1 %v1495_v7  ;;  %1482 = vmatpush3.bf16.msra.mxu0 %v1705_v45 }
 0x362   :  { %v512_v5 = vpop.f32.mrb[4].mxu0 }
 0x363   :  { %v513_v6 = vadd.f32 %v981_v1, %v512_v5  ;;  %v1220_v10 = vpop.f32.mrb[5].mxu0 }
 0x365   :  { %955 = vrot.lane.b32.xlu1 %v513_v6, %s1498_s30 }
 0x366   :  { %v660_v11 = vpop.f32.mrb[8].mxu1  ;;  %v805_v13 = vpop.f32.mrb[6].mxu0 }
 0x367   :  { %v661_v14 = vadd.f32 %v1713_v46, %v660_v11  ;;  %v1244_v16 = vpop.f32.mrb[9].mxu1  ;;  %v1284_v17 = vpop.f32.mrb[7].mxu0  ;;  %v806_v19 = vadd.f32 %v1679_v37, %v805_v13 }
 0x369   :  { %v664_v18 = vmax.f32 %v661_v14, 0.0  ;;  %v809_v20 = vmax.f32 %v806_v19, 0.0 }
 0x36b   :  { %1278 = vmatmul.mubr.f32.vlgmr.msra.gmra.mrb[10].mxu1 %v664_v18 }
 0x36c   :  { %1449 = vmatpush3.bf16.msra.mxu1 %v1572_v8  ;;  %1301 = vmatprep.mubr.msk.f32.mxu1 %vm1493_vm2, %v1492_v0 }
 0x36d   :  { %1450 = vmatprep.subr.bf16.mxu1 %v1495_v7 }
 0x370   :  { %1452 = vmatpush3.bf16.msra.mxu1 %v1578_v9 }
 0x371   :  { %1453 = vmatprep.subr.bf16.mxu1 %v1495_v7 }
 0x374   :  { %1455 = vmatpush3.bf16.msra.mxu1 %v1590_v12 }
 0x375   :  { %1456 = vmatprep.subr.bf16.mxu1 %v1495_v7 }
 0x378   :  { %1458 = vmatpush3.bf16.msra.mxu1 %v1601_v15  ;;  %v294_v15 = vadd.f32 %v981_v1, %v1752_v56 }
 0x37b   :  { %1302 = vmatmul.mubr.msk.f32.vlgmr.msra.gmra.mrb[12].mxu1 %vm146_vm3, %v809_v20 }
 0x3d7   :  { %v956_v7 = vpop.permute.xlu1 %955 }
 0x3d8   :  { %v967_v28 = vsel %vm966_vm4, %v294_v15, %v956_v7 }
 0x43e   :  { %v731_v8 = vpop.f32.mrb[10].mxu1 }
 0x43f   :  { %v732_v21 = vadd.f32 %v981_v1, %v731_v8  ;;  %v1279_v0 = vpop.f32.mrb[11].mxu1 }
 0x441   :  { %959 = vrot.lane.b32.xlu0 %v732_v21, %s1499_s6 }
 0x44e   :  { %v879_v22 = vpop.f32.mrb[12].mxu1 }
 0x44f   :  { %v880_v9 = vadd.f32 %v1713_v46, %v879_v22  ;;  %v1303_v23 = vpop.f32.mrb[13].mxu1 }
 0x451   :  { %v883_v24 = vmax.f32 %v880_v9, 0.0 }
 0x453   :  { %1337 = vmatmul.mubr.f32.vlgmr.msra.gmra.mrb[8].mxu0 %v883_v24 }
 0x4b3   :  { %v960_v27 = vpop.permute.xlu0 %959 }
 0x4b4   :  { %v968_v29 = vsel %vm146_vm3, %v967_v28, %v960_v27 }
 0x526   :  { %v950_v25 = vpop.f32.mrb[8].mxu0 }
 0x527   :  { %v951_v12 = vadd.f32 %v981_v1, %v950_v25  ;;  %v1338_v26 = vpop.f32.mrb[9].mxu0 }
 0x529   :  { %963 = vrot.lane.b32.xlu1 %v951_v12, %s1500_s1 }
 0x59b   :  { %v964_v30 = vpop.permute.xlu1 %963 }
 0x59c   :  { %v970_v31 = vsel %vm969_vm5, %v968_v29, %v964_v30 }
 0x59d   :  { %971 = vst [vmem:[%s1826_s7] sm:$0xff] %v970_v31 }

</bundles_post_ra>
